<compile_context>
chip_gen: v6e
topology: v6e:2x2x1
jax: 0.10.0
libtpu: 0.0.40
codegen_flags: <defaults>
</compile_context>

<pallas_src>
import numpy as np
import jax
import jax.numpy as jnp
from jax.experimental import pallas as pl
from jax.experimental.pallas import tpu as pltpu


NONLINEARITIES = {
    "relu": lambda x: jnp.maximum(x, 0.0),
    "tanh": jnp.tanh,
    "sigmoid": jax.nn.sigmoid,
    "elu": jax.nn.elu,
    "softplus": jax.nn.softplus,
}


# ----------------------------- Pallas kernel --------------------------------

def _make_fused_mlp_kernel(activations):
    """Whole per-d MLP fused into one kernel body.

    Refs (in order): x (TB, d*I), W_0..W_{L-1} (block-diagonal, (d*I_l, d*H_l)),
    b_0..b_{L-1} ((1, d*H_l)), out (TB, d*H_last).  Intermediates stay in
    VMEM/vregs; the Python layer loop is statically unrolled.
    """
    n_layers = len(activations)

    def kernel(x_ref, *refs):
        w_refs = refs[:n_layers]
        b_refs = refs[n_layers:2 * n_layers]
        o_ref = refs[2 * n_layers]
        h = x_ref[...]
        for l in range(n_layers):                      # static unroll
            h = jnp.dot(h, w_refs[l][...],
                        preferred_element_type=jnp.float32)
            h = h + b_refs[l][...]                     # (1, d*H) broadcasts over rows
            if activations[l] is not None:
                h = activations[l](h)
        o_ref[...] = h.astype(o_ref.dtype)

    return kernel


def _select_activations(n_layers, nonlinearity, act_last):
    """Per-layer activation selection, identical to the PyTorch module."""
    acts = []
    for l in range(n_layers):
        is_last = (l + 1 == n_layers)
        if not is_last:
            acts.append(NONLINEARITIES[nonlinearity])
        elif act_last is not None:
            acts.append(NONLINEARITIES[act_last])
        else:
            acts.append(None)
    return tuple(acts)


# ----------------------- one-time parameter preparation ----------------------

def _block_diag_weights(W):
    """[d, I, H] -> exact block-diagonal [d*I, d*H] (off-diagonal blocks are 0.0)."""
    d, I, H = W.shape
    eye = jnp.eye(d, dtype=W.dtype)
    return jnp.einsum("dih,dk->dikh", W, eye).reshape(d * I, d * H)


def prepare_mlp_batch_params(params):
    """Hoisted out of the forward path: run ONCE after init / param update.

    Produces the lane-dense block-diagonal weight stacks and row-shaped biases
    consumed directly by the kernel, so the per-call path does no layout work.
    """
    Ws, bs = params["W"], params["b"]
    d = Ws[0].shape[0]
    W_bd = tuple(_block_diag_weights(W) for W in Ws)        # (d*I_l, d*H_l)
    b_row = tuple(b.reshape(1, d * b.shape[-1]) for b in bs)  # (1, d*H_l)
    return {"W_bd": W_bd, "b_row": b_row}


# --------------------------------- forward ----------------------------------

def mlp_batch_forward(x, prepared, nonlinearity="relu", act_last=None,
                      batch_tile=512):
    """x: [batch, d, input_dim] -> [batch, d, last_hidden].

    Single fused pallas_call; forward semantics identical to MLP_Batch.forward.
    `prepared` comes from prepare_mlp_batch_params (one-time layout prep).
    """
    W_bd, b_row = prepared["W_bd"], prepared["b_row"]
    n_layers = len(W_bd)
    B, d, I = x.shape
    dI = d * I
    dH_last = W_bd[-1].shape[-1]
    H_last = dH_last // d

    activations = _select_activations(n_layers, nonlinearity, act_last)
    kernel = _make_fused_mlp_kernel(activations)

    # Contiguous reshape only (no transpose, no HBM copy).
    x2d = x.reshape(B, dI)

    # Explicit VMEM budget (item: re-derive for v7x's 64 MiB VMEM).
    itemsize = x.dtype.itemsize
    param_bytes = (sum(w.size * w.dtype.itemsize for w in W_bd)
                   + sum(b.size * b.dtype.itemsize for b in b_row))
    tb_eff = B if B <= batch_tile else batch_tile
    max_width = max([dI] + [w.shape[-1] for w in W_bd])
    footprint = (2 * (tb_eff * dI + tb_eff * dH_last) * itemsize   # in/out tiles (2x buffered)
                 + 2 * param_bytes                                  # resident weights/biases
                 + 4 * tb_eff * max_width * 4)                      # f32 intermediates slack
    vmem_limit = int(min(max(2 * footprint, 32 << 20), 48 << 20))

    n_in = 1 + 2 * n_layers

    if B <= batch_tile:
        # Single invocation: no grid -> no dummy 1-step pipeline, no useless
        # double-buffering; whole arrays placed in VMEM.
        out2d = pl.pallas_call(
            kernel,
            out_shape=jax.ShapeDtypeStruct((B, dH_last), x.dtype),
            in_specs=[pl.BlockSpec(memory_space=pltpu.MemorySpace.VMEM)] * n_in,
            out_specs=pl.BlockSpec(memory_space=pltpu.MemorySpace.VMEM),
            compiler_params=pltpu.CompilerParams(vmem_limit_bytes=vmem_limit),
        )(x2d, *W_bd, *b_row)
        return out2d.reshape(B, d, H_last)

    # Batch-tiled path: 'parallel' grid axis (v7x megacore); weight/bias block
    # indices are batch-independent so they stay VMEM-resident across steps.
    tb = batch_tile
    nb = pl.cdiv(B, tb)
    Bp = nb * tb
    if Bp != B:
        x2d = jnp.pad(x2d, ((0, Bp - B), (0, 0)))
    out2d = pl.pallas_call(
        kernel,
        out_shape=jax.ShapeDtypeStruct((Bp, dH_last), x.dtype),
        grid=(nb,),
        in_specs=(
            [pl.BlockSpec((tb, dI), lambda i: (i, 0))]
            + [pl.BlockSpec(w.shape, lambda i: (0, 0)) for w in W_bd]
            + [pl.BlockSpec(b.shape, lambda i: (0, 0)) for b in b_row]
        ),
        out_specs=pl.BlockSpec((tb, dH_last), lambda i: (i, 0)),
        compiler_params=pltpu.CompilerParams(
            dimension_semantics=("parallel",),
            vmem_limit_bytes=vmem_limit),
    )(x2d, *W_bd, *b_row)
    if Bp != B:
        out2d = out2d[:B]
    return out2d.reshape(B, d, H_last)


# ------------------------- parameter construction ---------------------------

def _glorot_uniform(key, shape):
    """Mirror of multidag glorot_uniform (biases are Parameters, so they go
    through glorot too in weights_init)."""
    if len(shape) == 2:
        fan_in, fan_out = shape
    elif len(shape) == 3:
        fan_in = shape[1] * shape[2]
        fan_out = shape[0] * shape[2]
    else:
        fan_in = fan_out = int(np.prod(shape))
    limit = float(np.sqrt(6.0 / (fan_in + fan_out)))
    return jax.random.uniform(key, shape, jnp.float32, -limit, limit)


def init_mlp_batch_params(key, d, input_dim, hidden_dims):
    dims = tuple(int(h) for h in hidden_dims.split("-"))
    Ws, bs = [], []
    prev = input_dim
    for h in dims:
        key, kw, kb = jax.random.split(key, 3)
        Ws.append(_glorot_uniform(kw, (d, prev, h)))
        bs.append(_glorot_uniform(kb, (d, h)))
        prev = h
    return {"W": Ws, "b": bs}


# ------------------------------ reference -----------------------------------

def mlp_batch_reference(x, params, nonlinearity="relu", act_last=None):
    n_layers = len(params["W"])
    for l in range(n_layers):
        x = jnp.einsum("bdi,dij->bdj", x, params["W"][l]) + params["b"][l]
        is_last = (l + 1 == n_layers)
        if (not is_last) or (act_last is not None):
            name = act_last if (is_last and act_last is not None) else nonlinearity
            x = NONLINEARITIES[name](x)
    return x


# --------------------------------- main --------------------------------------

if __name__ == "__main__":
    key = jax.random.PRNGKey(0)
    d, input_dim = 4, 16
    hidden_dims = "32-32"

    key, kp = jax.random.split(key)
    params = init_mlp_batch_params(kp, d, input_dim, hidden_dims)
    prepared = prepare_mlp_batch_params(params)     # one-time, hoisted out of forward
    prepared = jax.tree_util.tree_map(jax.block_until_ready, prepared)

    fwd = jax.jit(mlp_batch_forward,
                  static_argnames=("nonlinearity", "act_last", "batch_tile"))

    # --- Test 1: small batch -> no-grid single-invocation path ---------------
    key, kx = jax.random.split(key)
    x_small = jax.random.normal(kx, (8, d, input_dim), jnp.float32)
    out = jax.block_until_ready(fwd(x_small, prepared,
                                    nonlinearity="relu", act_last=None))
    ref = mlp_batch_reference(x_small, params, nonlinearity="relu", act_last=None)
    np.testing.assert_allclose(np.asarray(out), np.asarray(ref),
                               rtol=1e-5, atol=1e-5)

    # --- Test 2: larger batch -> 'parallel' batch-tiled path (VMEM-resident
    #             weights across tiles), exercising act_last too --------------
    key, kx2 = jax.random.split(key)
    x_big = jax.random.normal(kx2, (256, d, input_dim), jnp.float32)
    out2 = jax.block_until_ready(fwd(x_big, prepared,
                                     nonlinearity="relu", act_last="tanh",
                                     batch_tile=128))
    ref2 = mlp_batch_reference(x_big, params, nonlinearity="relu", act_last="tanh")
    np.testing.assert_allclose(np.asarray(out2), np.asarray(ref2),
                               rtol=1e-5, atol=1e-5)

    print("KERNEL_OK")
</pallas_src>

<mosaic_0001>
module attributes {stable_mosaic.version = 11 : i64} {
  func.func @kernel(%arg0: memref<8x64xf32, #tpu.memory_space<vmem>>, %arg1: memref<64x128xf32, #tpu.memory_space<vmem>>, %arg2: memref<128x128xf32, #tpu.memory_space<vmem>>, %arg3: memref<1x128xf32, #tpu.memory_space<vmem>>, %arg4: memref<1x128xf32, #tpu.memory_space<vmem>>, %arg5: memref<8x128xf32, #tpu.memory_space<vmem>>) attributes {dimension_semantics = [], scalar_prefetch = 0 : i64, scratch_operands = 0 : i64, tpu.core_type = #tpu.core_type<tc>} {
    %c0 = arith.constant 0 : index
    %c0_0 = arith.constant 0 : index
    %0 = vector.load %arg0[%c0, %c0_0] : memref<8x64xf32, #tpu.memory_space<vmem>>, vector<8x64xf32>
    %c0_1 = arith.constant 0 : index
    %c0_2 = arith.constant 0 : index
    %1 = vector.load %arg1[%c0_1, %c0_2] : memref<64x128xf32, #tpu.memory_space<vmem>>, vector<64x128xf32>
    %cst = arith.constant dense<0.000000e+00> : vector<8x128xf32>
    %2 = tpu.matmul %0, %1, %cst {dimension_numbers = #tpu.dot_dimension_numbers<[1], [0], [0], [1], [0, 0, 1, 1], [], []>} : vector<8x64xf32>, vector<64x128xf32>, vector<8x128xf32> -> vector<8x128xf32>
    %c0_3 = arith.constant 0 : index
    %c0_4 = arith.constant 0 : index
    %3 = vector.load %arg3[%c0_3, %c0_4] : memref<1x128xf32, #tpu.memory_space<vmem>>, vector<1x128xf32>
    %4 = vector.broadcast %3 : vector<1x128xf32> to vector<8x128xf32>
    %5 = arith.addf %2, %4 : vector<8x128xf32>
    %cst_5 = arith.constant 0.000000e+00 : f32
    %6 = vector.broadcast %cst_5 : f32 to vector<8x128xf32>
    %7 = arith.maximumf %5, %6 : vector<8x128xf32>
    %c0_6 = arith.constant 0 : index
    %c0_7 = arith.constant 0 : index
    %8 = vector.load %arg2[%c0_6, %c0_7] : memref<128x128xf32, #tpu.memory_space<vmem>>, vector<128x128xf32>
    %cst_8 = arith.constant dense<0.000000e+00> : vector<8x128xf32>
    %9 = tpu.matmul %7, %8, %cst_8 {dimension_numbers = #tpu.dot_dimension_numbers<[1], [0], [0], [1], [0, 0, 1, 1], [], []>} : vector<8x128xf32>, vector<128x128xf32>, vector<8x128xf32> -> vector<8x128xf32>
    %c0_9 = arith.constant 0 : index
    %c0_10 = arith.constant 0 : index
    %10 = vector.load %arg4[%c0_9, %c0_10] : memref<1x128xf32, #tpu.memory_space<vmem>>, vector<1x128xf32>
    %11 = vector.broadcast %10 : vector<1x128xf32> to vector<8x128xf32>
    %12 = arith.addf %9, %11 : vector<8x128xf32>
    %c0_11 = arith.constant 0 : index
    %c0_12 = arith.constant 0 : index
    %13 = vector.load %arg5[%c0_11, %c0_12] : memref<8x128xf32, #tpu.memory_space<vmem>>, vector<8x128xf32>
    tpu.vector_store %arg5[%c0_11, %c0_12], %12 {strides = array<i32>} : memref<8x128xf32, #tpu.memory_space<vmem>>, vector<8x128xf32>,
    return
  }
}

</mosaic_0001>

<bundles_post_ra>
// kernel: mlp_batch_forward.1
= control target key start
LH: loop header
LB: loop body
LE: loop exit
PB: predicated region body
PF: predicated region fallthrough
CT: control target
= control target key end

     0   :  { %10 = vsyncpa [#allocation3], 0  ;;  %s452_s0 = inlined_call_operand.vmem [shape: f32[8,64], index: 0, kind: input, shape index: {}]   ;;  %s453_s1 = inlined_call_operand.hbm [shape: f32[64,128], index: 1, kind: input, shape index: {}]   ;;  %s454_s2 = inlined_call_operand.hbm [shape: f32[128,128], index: 2, kind: input, shape index: {}]   ;;  %s455_s3 = inlined_call_operand.vmem [shape: f32[1,128], index: 3, kind: input, shape index: {}]   ;;  %s456_s4 = inlined_call_operand.vmem [shape: f32[1,128], index: 4, kind: input, shape index: {}]   ;;  %s457_s5 = inlined_call_operand.vmem [shape: f32[8,128], index: 5, kind: output, shape index: {}]  }
   0x1   :  { %11 = vsyncpa [#allocation5], 0  ;;  %s372_s18 = smov [#allocation2]  }
   0x2   :  { %s19_s19 = sshll.u32 %s372_s18, 4  ;;  %s20_s19 = int_to_ptr.vmem [resolvable:$true] %s19_s19 }
   0x3   :  { %s336_s20 = scalar_lea.vmem %s20_s19, 1024  ;;  %p341_p1 = scmp.lt.s32.totalorder %s20_s19, %s20_s19 }
   0x4   :  { %p337_p0 = scmp.ne.s32.totalorder %s20_s19, %s336_s20  ;;  %p342_p2 = scmp.lt.s32.totalorder %s336_s20, %s336_s20 }
   0x6   :  { %p343_p3 = por %p342_p2, %p341_p1 }
   0x8   :  { %p344_p4 = pnand %p343_p3, %p337_p0 }
   0xa   :  { %347 = shalt.err (!%p344_p4)
}
   0xb   :  { %s373_s21 = smov 128   ;;  %s374_s22 = smov 8  }
   0xc   :  { %25 = dma.hbm_to_vmem [thread:$0]  %s453_s1, 1024, %s20_s19, [#allocation3], %s373_s21, %s373_s21, %s374_s22  }
   0xd   :  { %s375_s25 = smov [#allocation4]  }
   0xe   :  { %s31_s26 = sshll.u32 %s375_s25, 4  ;;  %s32_s26 = int_to_ptr.vmem [resolvable:$true] %s31_s26 }
   0xf   :  { %s356_s27 = scalar_lea.vmem %s32_s26, 2048  ;;  %p361_p6 = scmp.lt.s32.totalorder %s32_s26, %s32_s26 }
  0x10   :  { %p357_p5 = scmp.ne.s32.totalorder %s32_s26, %s356_s27  ;;  %p362_p7 = scmp.lt.s32.totalorder %s356_s27, %s356_s27 }
  0x12   :  { %p363_p8 = por %p362_p7, %p361_p6 }
  0x14   :  { %p364_p9 = pnand %p363_p8, %p357_p5 }
  0x16   :  { %367 = shalt.err (!%p364_p9)
}
  0x17   :  { %37 = dma.hbm_to_vmem [thread:$0]  %s454_s2, 2048, %s32_s26, [#allocation5], %s373_s21, %s373_s21, %s374_s22  }
  0x18   :  { %368 = dma.done.wait [#allocation3], 1024  }
  0x19   :  { %369 = vsyncadd [#allocation3], 4294966272 }
  0x1a   :  { %370 = dma.done.wait [#allocation5], 2048  }
  0x1b   :  { %371 = vsyncadd [#allocation5], 4294965248  ;;  %v376_v0 = vmov 0.0   ;;  %vm377_vm0 = vmmov 0   ;;  %v56_v1 = vld [vmem:[#allocation2 + $0x38] sm:$0xff]  ;;  %v55_v2 = vld [vmem:[#allocation2 + $0x30] sm:$0xff] }
  0x1c   :  { %268 = vmatprep.subr.mxu0 %v376_v0  ;;  %284 = vmatprep.mubr.msk.f32.mxu0 %vm377_vm0, %v376_v0  ;;  %v54_v3 = vld [vmem:[#allocation2 + $0x28] sm:$0xff]  ;;  %v154_v4 = vld [vmem:[#allocation4 + $0x78] sm:$0xff]  ;;  %v153_v5 = vld [vmem:[#allocation4 + $0x70] sm:$0xff]  ;;  %vm64_vm1 = vcmask 523264  }
  0x1d   :  { %287 = vmatprep.subr.mxu1 %v376_v0  ;;  %319 = vmatprep.mubr.msk.f32.mxu1 %vm377_vm0, %v376_v0  ;;  %v53_v6 = vld [vmem:[#allocation2 + $0x20] sm:$0xff]  ;;  %v152_v7 = vld [vmem:[#allocation4 + $0x68] sm:$0xff]  ;;  %v52_v8 = vld [vmem:[#allocation2 + $0x18] sm:$0xff] }
  0x1e   :  { %269 = vmatpush3.msra.mxu0 %v56_v1  ;;  %288 = vmatpush3.msra.mxu1 %v154_v4  ;;  %v151_v9 = vld [vmem:[#allocation4 + $0x60] sm:$0xff]  ;;  %v51_v10 = vld [vmem:[#allocation2 + $0x10] sm:$0xff]  ;;  %v150_v11 = vld [vmem:[#allocation4 + $0x58] sm:$0xff] }
  0x1f   :  { %270 = vmatprep.subr.mxu0 %v376_v0  ;;  %289 = vmatprep.subr.mxu1 %v376_v0  ;;  %v50_v12 = vld [vmem:[#allocation2 + $0x8] sm:$0xff]  ;;  %v149_v13 = vld [vmem:[#allocation4 + $0x50] sm:$0xff]  ;;  %v49_v14 = vld [vmem:[#allocation2] sm:$0xff] }
  0x20   :  { %271 = vmatpush3.msra.mxu0 %v55_v2  ;;  %290 = vmatpush3.msra.mxu1 %v153_v5  ;;  %v48_v15 = vld [vmem:[%s452_s0] sm:$0xff]  ;;  %v148_v16 = vld [vmem:[#allocation4 + $0x48] sm:$0xff]  ;;  %v146_v18 = vld [vmem:[#allocation4 + $0x38] sm:$0xff] }
  0x21   :  { %272 = vmatprep.subr.mxu0 %v376_v0  ;;  %291 = vmatprep.subr.mxu1 %v376_v0  ;;  %v147_v17 = vld [vmem:[#allocation4 + $0x40] sm:$0xff]  ;;  %v145_v19 = vld [vmem:[#allocation4 + $0x30] sm:$0xff]  ;;  %v144_v20 = vld [vmem:[#allocation4 + $0x28] sm:$0xff] }
  0x22   :  { %273 = vmatpush3.msra.mxu0 %v54_v3  ;;  %292 = vmatpush3.msra.mxu1 %v152_v7  ;;  %v143_v21 = vld [vmem:[#allocation4 + $0x20] sm:$0xff]  ;;  %v142_v22 = vld [vmem:[#allocation4 + $0x18] sm:$0xff]  ;;  %v141_v23 = vld [vmem:[#allocation4 + $0x10] sm:$0xff] }
  0x23   :  { %274 = vmatprep.subr.mxu0 %v376_v0  ;;  %293 = vmatprep.subr.mxu1 %v376_v0  ;;  %v140_v24 = vld [vmem:[#allocation4 + $0x8] sm:$0xff]  ;;  %v139_v25 = vld [vmem:[#allocation4] sm:$0xff] }
  0x24   :  { %275 = vmatpush3.msra.mxu0 %v53_v6  ;;  %294 = vmatpush3.msra.mxu1 %v151_v9  ;;  %v239_v26 = vld [vmem:[%s455_s3] ss:$0 sm:$0xff] }
  0x25   :  { %276 = vmatprep.subr.mxu0 %v376_v0  ;;  %295 = vmatprep.subr.mxu1 %v376_v0  ;;  %v241_v31 = vld [vmem:[%s456_s4] ss:$0 sm:$0xff] }
  0x26   :  { %277 = vmatpush3.msra.mxu0 %v52_v8  ;;  %296 = vmatpush3.msra.mxu1 %v150_v11 }
  0x27   :  { %278 = vmatprep.subr.mxu0 %v376_v0  ;;  %297 = vmatprep.subr.mxu1 %v376_v0 }
  0x28   :  { %279 = vmatpush3.msra.mxu0 %v51_v10  ;;  %298 = vmatpush3.msra.mxu1 %v149_v13 }
  0x29   :  { %280 = vmatprep.subr.mxu0 %v376_v0  ;;  %299 = vmatprep.subr.mxu1 %v376_v0 }
  0x2a   :  { %281 = vmatpush3.msra.mxu0 %v50_v12  ;;  %300 = vmatpush3.msra.mxu1 %v148_v16 }
  0x2b   :  { %282 = vmatprep.subr.mxu0 %v376_v0  ;;  %301 = vmatprep.subr.mxu1 %v376_v0 }
  0x2c   :  { %283 = vmatpush3.msra.mxu0 %v49_v14  ;;  %302 = vmatpush3.msra.mxu1 %v147_v17 }
  0x2d   :  { %285 = vmatmul.mubr.msk.f32.vlgmr.msra.gmra.mxu0 %vm64_vm1, %v48_v15  ;;  %303 = vmatprep.subr.mxu1 %v376_v0 }
  0x2e   :  { %304 = vmatpush3.msra.mxu1 %v146_v18 }
  0x2f   :  { %305 = vmatprep.subr.mxu1 %v376_v0 }
  0x30   :  { %306 = vmatpush3.msra.mxu1 %v145_v19 }
  0x31   :  { %307 = vmatprep.subr.mxu1 %v376_v0 }
  0x32   :  { %308 = vmatpush3.msra.mxu1 %v144_v20 }
  0x33   :  { %309 = vmatprep.subr.mxu1 %v376_v0 }
  0x34   :  { %310 = vmatpush3.msra.mxu1 %v143_v21 }
  0x35   :  { %311 = vmatprep.subr.mxu1 %v376_v0 }
  0x36   :  { %312 = vmatpush3.msra.mxu1 %v142_v22 }
  0x37   :  { %313 = vmatprep.subr.mxu1 %v376_v0 }
  0x38   :  { %314 = vmatpush3.msra.mxu1 %v141_v23 }
  0x39   :  { %315 = vmatprep.subr.mxu1 %v376_v0 }
  0x3a   :  { %316 = vmatpush3.msra.mxu1 %v140_v24 }
  0x3b   :  { %317 = vmatprep.subr.mxu1 %v376_v0 }
  0x3c   :  { %318 = vmatpush3.msra.mxu1 %v139_v25 }
  0xed   :  { %v134_v27 = vpop.f32.mrf.mxu0 }
  0xee   :  { %v135_v28 = vadd.f32 %v239_v26, %v134_v27 }
  0xef   :  { %v286_v29 = vpop.f32.mrf.mxu0 }
  0xf0   :  { %v138_v30 = vmax.f32 %v135_v28, 0.0 }
  0xf2   :  { %320 = vmatmul.mubr.f32.vlgmr.msra.gmra.mxu1 %v138_v30 }
 0x1b2   :  { %v228_v32 = vpop.f32.mrf.mxu1 }
 0x1b3   :  { %v229_v33 = vadd.f32 %v241_v31, %v228_v32 }
 0x1b4   :  { %v321_v34 = vpop.f32.mrf.mxu1 }
 0x1b5   :  { %232 = vst [vmem:[%s457_s5] sm:$0xff] %v229_v33 }
 0x1b6   :  { %237 = vsyncpa [#allocation3], 1 }
 0x1b7   :  { %238 = vsyncpa [#allocation5], 1 }

</bundles_post_ra>
